<compile_context>
chip_gen: v7x
topology: tpu7x:2x2x1
jax: 0.10.0
libtpu: 0.0.40
codegen_flags: <defaults>
</compile_context>

<pallas_src>
import functools

import jax
import jax.numpy as jnp
from jax.experimental import pallas as pl
from jax.experimental.pallas import tpu as pltpu


def _round_up(v: int, m: int) -> int:
    return ((v + m - 1) // m) * m


def _kgcn_kernel(sm_ref, adj_ref, x_ref, w1t_ref, b1_ref, w2t_ref, b2_ref,
                 out_ref, *, two_rel: bool):
    """Row-tile kernel: adj_ref is (R, TM, N); x/out are (TM, F_pad)/(TM, H_pad)."""
    # Relation-weighted rowsum without materializing the weighted adjacency.
    if two_rel:
        rs = (sm_ref[0] * jnp.sum(adj_ref[0], axis=1, keepdims=True)
              + sm_ref[1] * jnp.sum(adj_ref[1], axis=1, keepdims=True))
    else:
        rs = jnp.sum(adj_ref[0], axis=1, keepdims=True)          # (TM, 1)

    d = jax.lax.rsqrt(rs)                                        # rowsum ** -0.5

    xn = d * x_ref[...]                                          # diag(d) @ x
    h = jnp.dot(xn, w1t_ref[...], preferred_element_type=jnp.float32)
    h = jnp.maximum(h + b1_ref[...], 0.0)                        # fc1 + ReLU
    h = d * h                                                    # diag(d) @ h
    o = jnp.dot(h, w2t_ref[...], preferred_element_type=jnp.float32)
    out_ref[...] = (o + b2_ref[...]).astype(out_ref.dtype)       # fc2


def k_gcn_layer(node_feature, adj_s, weights, w1, b1, w2, b2):
    """JAX wrapper reproducing K_GCN_layer.forward.

    node_feature: (N, f_dim) f32
    adj_s:        (2, N, N) or (N, N) f32
    weights:      (2,) f32      (self.weights)
    w1: (H, f_dim), b1: (H,)    (fc1, PyTorch layout)
    w2: (H, H),     b2: (H,)    (fc2, PyTorch layout)
    """
    n, f_dim = node_feature.shape
    hidden = w1.shape[0]

    two_rel = (adj_s.ndim == 3 and adj_s.shape[0] == 2)
    adj3 = (adj_s if adj_s.ndim == 3 else adj_s[None]).astype(jnp.float32)
    r = adj3.shape[0]

    # 2-element softmax of the relation weights (parameter glue, fed via SMEM).
    if two_rel:
        sm = jax.nn.softmax(weights.astype(jnp.float32))
    else:
        sm = jnp.array([1.0, 0.0], dtype=jnp.float32)

    # Lane-dense padding of feature / hidden dims (zeros -> identical result).
    f_pad = _round_up(f_dim, 128)
    h_pad = _round_up(hidden, 128)

    x = node_feature.astype(jnp.float32)
    if f_pad != f_dim:
        x = jnp.pad(x, ((0, 0), (0, f_pad - f_dim)))
    w1t = jnp.zeros((f_pad, h_pad), jnp.float32).at[:f_dim, :hidden].set(
        jnp.transpose(w1).astype(jnp.float32))
    w2t = jnp.zeros((h_pad, h_pad), jnp.float32).at[:hidden, :hidden].set(
        jnp.transpose(w2).astype(jnp.float32))
    b1p = jnp.zeros((1, h_pad), jnp.float32).at[0, :hidden].set(b1.astype(jnp.float32))
    b2p = jnp.zeros((1, h_pad), jnp.float32).at[0, :hidden].set(b2.astype(jnp.float32))

    # Row-tile size: largest tile (<= 256) dividing N whose double-buffered
    # adjacency blocks fit a ~32 MiB budget (safe on v7x's 64 MiB VMEM).
    adj_budget = 32 * 1024 * 1024
    tm = n
    for cand in (256, 128, 64, 32, 16, 8):
        if n % cand == 0 and 2 * r * cand * n * 4 <= adj_budget:
            tm = cand
            break
    # TODO(synk): if N is not a multiple of 8 and too large for a single block,
    # pad N with zero rows (their NaN outputs would be sliced off).

    grid = (n // tm,)

    resident = 4 * (f_pad * h_pad + h_pad * h_pad + 2 * h_pad)
    per_step = 4 * (r * tm * n + tm * f_pad + tm * h_pad)
    vmem_limit = int(min(64 << 20, max(32 << 20, 2 * (resident + per_step) + (4 << 20))))

    kernel = functools.partial(_kgcn_kernel, two_rel=two_rel)

    out_pad = pl.pallas_call(
        kernel,
        out_shape=jax.ShapeDtypeStruct((n, h_pad), jnp.float32),
        grid_spec=pl.GridSpec(
            grid=grid,
            in_specs=[
                pl.BlockSpec(memory_space=pltpu.MemorySpace.SMEM),   # sm (2,) scalars
                pl.BlockSpec((r, tm, n), lambda i: (0, i, 0)),       # adj row slab
                pl.BlockSpec((tm, f_pad), lambda i: (i, 0)),         # x rows
                pl.BlockSpec((f_pad, h_pad), lambda i: (0, 0)),      # W1^T (resident)
                pl.BlockSpec((1, h_pad), lambda i: (0, 0)),          # b1
                pl.BlockSpec((h_pad, h_pad), lambda i: (0, 0)),      # W2^T (resident)
                pl.BlockSpec((1, h_pad), lambda i: (0, 0)),          # b2
            ],
            out_specs=pl.BlockSpec((tm, h_pad), lambda i: (i, 0)),
        ),
        compiler_params=pltpu.CompilerParams(
            dimension_semantics=("parallel",),
            vmem_limit_bytes=vmem_limit,
        ),
    )(sm, adj3, x, w1t, b1p, w2t, b2p)

    return out_pad[:, :hidden]


def _reference(node_feature, adj_s, weights, w1, b1, w2, b2):
    """Pure-JAX reference mirroring the PyTorch forward."""
    if adj_s.shape[0] == 2:
        w = jax.nn.softmax(weights)
        wadj = jnp.sum(adj_s * w[:, None, None], axis=0)
    else:
        wadj = adj_s
    d = jnp.sum(wadj, axis=1) ** (-0.5)
    norm = jnp.diag(d)
    out = jnp.matmul(norm, node_feature) @ w1.T + b1
    out = jnp.maximum(out, 0.0)
    out = jnp.matmul(norm, out)
    return out @ w2.T + b2


if __name__ == "__main__":
    # small shapes: N=8 nodes, f_dim=16, hidden_dim=32
    N, F_DIM, HIDDEN = 8, 16, 32

    key = jax.random.PRNGKey(0)
    k_x, k_adj, k_w, k_w1, k_b1, k_w2, k_b2 = jax.random.split(key, 7)

    node_feature = jax.random.normal(k_x, (N, F_DIM), dtype=jnp.float32)
    # positive adjacency so row sums are > 0 (rsqrt well-defined)
    adj_s = jax.random.uniform(k_adj, (2, N, N), dtype=jnp.float32,
                               minval=0.1, maxval=1.0)

    # deterministic parameter init (shapes match nn.Linear / nn.Parameter)
    weights = jax.random.uniform(k_w, (2,), dtype=jnp.float32)          # torch.rand(2)
    w1 = jax.random.uniform(k_w1, (HIDDEN, F_DIM), dtype=jnp.float32,
                            minval=-0.25, maxval=0.25)
    b1 = jax.random.uniform(k_b1, (HIDDEN,), dtype=jnp.float32,
                            minval=-0.25, maxval=0.25)
    w2 = jax.random.uniform(k_w2, (HIDDEN, HIDDEN), dtype=jnp.float32,
                            minval=-0.18, maxval=0.18)
    b2 = jax.random.uniform(k_b2, (HIDDEN,), dtype=jnp.float32,
                            minval=-0.18, maxval=0.18)

    out = k_gcn_layer(node_feature, adj_s, weights, w1, b1, w2, b2)
    out = jax.block_until_ready(out)

    ref = _reference(node_feature, adj_s, weights, w1, b1, w2, b2)
    assert out.shape == (N, HIDDEN)
    assert jnp.allclose(out, ref, atol=1e-5, rtol=1e-5), "mismatch vs reference"

    print("KERNEL_OK")
</pallas_src>

<mosaic_0001>
module attributes {stable_mosaic.version = 11 : i64} {
  func.func @_kgcn_kernel(%arg0: i32, %arg1: memref<2xf32, #tpu.memory_space<smem>>, %arg2: memref<2x8x8xf32, #tpu.memory_space<vmem>>, %arg3: memref<8x128xf32, #tpu.memory_space<vmem>>, %arg4: memref<128x128xf32, #tpu.memory_space<vmem>>, %arg5: memref<1x128xf32, #tpu.memory_space<vmem>>, %arg6: memref<128x128xf32, #tpu.memory_space<vmem>>, %arg7: memref<1x128xf32, #tpu.memory_space<vmem>>, %arg8: memref<8x128xf32, #tpu.memory_space<vmem>>) attributes {dimension_semantics = [#tpu.dimension_semantics<parallel>], iteration_bounds = array<i64: 1>, scalar_prefetch = 0 : i64, scratch_operands = 0 : i64, tpu.core_type = #tpu.core_type<tc>, window_params = [{transform_indices = @transform_0, window_bounds = array<i64: 2>}, {transform_indices = @transform_1, window_bounds = array<i64: 2, 8, 8>}, {transform_indices = @transform_2, window_bounds = array<i64: 8, 128>}, {pipeline_mode = #tpu.pipeline_mode<synchronous>, transform_indices = @transform_3, window_bounds = array<i64: 128, 128>}, {pipeline_mode = #tpu.pipeline_mode<synchronous>, transform_indices = @transform_4, window_bounds = array<i64: 1, 128>}, {pipeline_mode = #tpu.pipeline_mode<synchronous>, transform_indices = @transform_5, window_bounds = array<i64: 128, 128>}, {pipeline_mode = #tpu.pipeline_mode<synchronous>, transform_indices = @transform_6, window_bounds = array<i64: 1, 128>}, {transform_indices = @transform_7, window_bounds = array<i64: 8, 128>}]} {
    %c0 = arith.constant 0 : index
    %0 = memref.load %arg1[%c0] : memref<2xf32, #tpu.memory_space<smem>>
    %c0_0 = arith.constant 0 : index
    %c0_1 = arith.constant 0 : index
    %c0_2 = arith.constant 0 : index
    %1 = vector.load %arg2[%c0_0, %c0_1, %c0_2] : memref<2x8x8xf32, #tpu.memory_space<vmem>>, vector<1x8x8xf32>
    %2 = vector.shape_cast %1 : vector<1x8x8xf32> to vector<8x8xf32>
    %cst = arith.constant dense<0.000000e+00> : vector<8xf32>
    %3 = vector.multi_reduction <add>, %2, %cst [1] : vector<8x8xf32> to vector<8xf32>
    %4 = vector.shape_cast %3 : vector<8xf32> to vector<8x1xf32>
    %5 = vector.broadcast %0 : f32 to vector<8x1xf32>
    %6 = arith.mulf %5, %4 : vector<8x1xf32>
    %c1 = arith.constant 1 : index
    %7 = memref.load %arg1[%c1] : memref<2xf32, #tpu.memory_space<smem>>
    %c1_3 = arith.constant 1 : index
    %c0_4 = arith.constant 0 : index
    %c0_5 = arith.constant 0 : index
    %8 = vector.load %arg2[%c1_3, %c0_4, %c0_5] : memref<2x8x8xf32, #tpu.memory_space<vmem>>, vector<1x8x8xf32>
    %9 = vector.shape_cast %8 : vector<1x8x8xf32> to vector<8x8xf32>
    %cst_6 = arith.constant dense<0.000000e+00> : vector<8xf32>
    %10 = vector.multi_reduction <add>, %9, %cst_6 [1] : vector<8x8xf32> to vector<8xf32>
    %11 = vector.shape_cast %10 : vector<8xf32> to vector<8x1xf32>
    %12 = vector.broadcast %7 : f32 to vector<8x1xf32>
    %13 = arith.mulf %12, %11 : vector<8x1xf32>
    %14 = arith.addf %6, %13 : vector<8x1xf32>
    %15 = math.rsqrt %14 : vector<8x1xf32>
    %c0_7 = arith.constant 0 : index
    %c0_8 = arith.constant 0 : index
    %16 = vector.load %arg3[%c0_7, %c0_8] : memref<8x128xf32, #tpu.memory_space<vmem>>, vector<8x128xf32>
    %17 = vector.broadcast %15 : vector<8x1xf32> to vector<8x128xf32>
    %18 = arith.mulf %17, %16 : vector<8x128xf32>
    %c0_9 = arith.constant 0 : index
    %c0_10 = arith.constant 0 : index
    %19 = vector.load %arg4[%c0_9, %c0_10] : memref<128x128xf32, #tpu.memory_space<vmem>>, vector<128x128xf32>
    %cst_11 = arith.constant dense<0.000000e+00> : vector<8x128xf32>
    %20 = tpu.matmul %18, %19, %cst_11 {dimension_numbers = #tpu.dot_dimension_numbers<[1], [0], [0], [1], [0, 0, 1, 1], [], []>} : vector<8x128xf32>, vector<128x128xf32>, vector<8x128xf32> -> vector<8x128xf32>
    %c0_12 = arith.constant 0 : index
    %c0_13 = arith.constant 0 : index
    %21 = vector.load %arg5[%c0_12, %c0_13] : memref<1x128xf32, #tpu.memory_space<vmem>>, vector<1x128xf32>
    %22 = vector.broadcast %21 : vector<1x128xf32> to vector<8x128xf32>
    %23 = arith.addf %20, %22 : vector<8x128xf32>
    %cst_14 = arith.constant 0.000000e+00 : f32
    %24 = vector.broadcast %cst_14 : f32 to vector<8x128xf32>
    %25 = arith.maximumf %23, %24 : vector<8x128xf32>
    %26 = vector.broadcast %15 : vector<8x1xf32> to vector<8x128xf32>
    %27 = arith.mulf %26, %25 : vector<8x128xf32>
    %c0_15 = arith.constant 0 : index
    %c0_16 = arith.constant 0 : index
    %28 = vector.load %arg6[%c0_15, %c0_16] : memref<128x128xf32, #tpu.memory_space<vmem>>, vector<128x128xf32>
    %cst_17 = arith.constant dense<0.000000e+00> : vector<8x128xf32>
    %29 = tpu.matmul %27, %28, %cst_17 {dimension_numbers = #tpu.dot_dimension_numbers<[1], [0], [0], [1], [0, 0, 1, 1], [], []>} : vector<8x128xf32>, vector<128x128xf32>, vector<8x128xf32> -> vector<8x128xf32>
    %c0_18 = arith.constant 0 : index
    %c0_19 = arith.constant 0 : index
    %30 = vector.load %arg7[%c0_18, %c0_19] : memref<1x128xf32, #tpu.memory_space<vmem>>, vector<1x128xf32>
    %31 = vector.broadcast %30 : vector<1x128xf32> to vector<8x128xf32>
    %32 = arith.addf %29, %31 : vector<8x128xf32>
    %c0_20 = arith.constant 0 : index
    %c0_21 = arith.constant 0 : index
    %33 = vector.load %arg8[%c0_20, %c0_21] : memref<8x128xf32, #tpu.memory_space<vmem>>, vector<8x128xf32>
    tpu.vector_store %arg8[%c0_20, %c0_21], %32 {strides = array<i32>} : memref<8x128xf32, #tpu.memory_space<vmem>>, vector<8x128xf32>,
    return
  }
  func.func @transform_0(%arg0: i32) -> i32 {
    %c0_i32 = arith.constant 0 : i32
    %c0_i32_0 = arith.constant 0 : i32
    return %c0_i32 : i32
  }
  func.func @transform_1(%arg0: i32) -> (i32, i32, i32) {
    %c0_i32 = arith.constant 0 : i32
    %c0_i32_0 = arith.constant 0 : i32
    %c0_i32_1 = arith.constant 0 : i32
    return %c0_i32, %arg0, %c0_i32_0 : i32, i32, i32
  }
  func.func @transform_2(%arg0: i32) -> (i32, i32) {
    %c0_i32 = arith.constant 0 : i32
    %c0_i32_0 = arith.constant 0 : i32
    return %arg0, %c0_i32 : i32, i32
  }
  func.func @transform_3(%arg0: i32) -> (i32, i32) {
    %c0_i32 = arith.constant 0 : i32
    %c0_i32_0 = arith.constant 0 : i32
    %c0_i32_1 = arith.constant 0 : i32
    return %c0_i32, %c0_i32_0 : i32, i32
  }
  func.func @transform_4(%arg0: i32) -> (i32, i32) {
    %c0_i32 = arith.constant 0 : i32
    %c0_i32_0 = arith.constant 0 : i32
    %c0_i32_1 = arith.constant 0 : i32
    return %c0_i32, %c0_i32_0 : i32, i32
  }
  func.func @transform_5(%arg0: i32) -> (i32, i32) {
    %c0_i32 = arith.constant 0 : i32
    %c0_i32_0 = arith.constant 0 : i32
    %c0_i32_1 = arith.constant 0 : i32
    return %c0_i32, %c0_i32_0 : i32, i32
  }
  func.func @transform_6(%arg0: i32) -> (i32, i32) {
    %c0_i32 = arith.constant 0 : i32
    %c0_i32_0 = arith.constant 0 : i32
    %c0_i32_1 = arith.constant 0 : i32
    return %c0_i32, %c0_i32_0 : i32, i32
  }
  func.func @transform_7(%arg0: i32) -> (i32, i32) {
    %c0_i32 = arith.constant 0 : i32
    %c0_i32_0 = arith.constant 0 : i32
    return %arg0, %c0_i32 : i32, i32
  }
}

</mosaic_0001>

<bundles_post_ra>
// kernel: tpu_custom_call.1
= control target key start
LH: loop header
LB: loop body
LE: loop exit
PB: predicated region body
PF: predicated region fallthrough
CT: control target
= control target key end

     0   :  { %12 = vsyncpa [#allocation5], 0  ;;  %s770_s0 = inlined_call_operand.hbm [shape: f32[2], index: 0, kind: input, shape index: {}]   ;;  %s771_s1 = inlined_call_operand.hbm [shape: f32[2,8,8], index: 1, kind: input, shape index: {}]   ;;  %s772_s2 = inlined_call_operand.hbm [shape: f32[8,128], index: 2, kind: input, shape index: {}]   ;;  %s773_s3 = inlined_call_operand.hbm [shape: f32[128,128], index: 3, kind: input, shape index: {}]   ;;  %s774_s4 = inlined_call_operand.vmem [shape: f32[1,128], index: 4, kind: input, shape index: {}]   ;;  %s775_s5 = inlined_call_operand.hbm [shape: f32[128,128], index: 5, kind: input, shape index: {}]   ;;  %s776_s6 = inlined_call_operand.vmem [shape: f32[1,128], index: 6, kind: input, shape index: {}]   ;;  %s777_s7 = inlined_call_operand.hbm [shape: f32[8,128], index: 7, kind: output, shape index: {}]  }
   0x1   :  { %13 = vsyncpa [#allocation3], 0 }
   0x2   :  { %14 = vsyncpa [#allocation8], 0 }
   0x3   :  { %15 = vsyncpa [#allocation11], 0 }
   0x4   :  { %16 = vsyncpa [#allocation4], 0  ;;  %s616_s24 = smov [#allocation7]   ;;  %s617_s26 = smov [#allocation6]  }
   0x5   :  { %s43_s25 = sshll.u32 %s616_s24, 4  ;;  %s30_s27 = sshll.u32 %s617_s26, 4  ;;  %s44_s25 = int_to_ptr.vmem [resolvable:$true] %s43_s25  ;;  %s31_s27 = int_to_ptr.vmem [resolvable:$true] %s30_s27 }
   0x6   :  { %s486_s30 = scalar_lea.hbm %s772_s2, 128 }
   0x7   :  { %p487_p0 = scmp.ne.s32.totalorder %s772_s2, %s486_s30  ;;  %p490_p1 = scmp.lt.u32.totalorder %s486_s30, %s772_s2 }
   0x9   :  { %p492_p2 = pnand %p490_p1, %p487_p0 }
   0xb   :  { %495 = shalt.err (!%p492_p2)
}
   0xc   :  { %s496_s12 = scalar_lea.vmem %s44_s25, 128  ;;  %p501_p4 = scmp.lt.s32.totalorder %s44_s25, %s44_s25 }
   0xd   :  { %p497_p3 = scmp.ne.s32.totalorder %s44_s25, %s496_s12  ;;  %p502_p5 = scmp.lt.s32.totalorder %s496_s12, %s496_s12 }
   0xf   :  { %p503_p6 = por %p502_p5, %p501_p4 }
  0x11   :  { %p504_p7 = pnand %p503_p6, %p497_p3 }
  0x13   :  { %507 = shalt.err (!%p504_p7)
}
  0x14   :  { %46 = dma.hbm_to_vmem [thread:$0]  %s772_s2, 128, %s44_s25, [#allocation8]  }
  0x15   :  { %s508_s17 = scalar_lea.hbm %s770_s0, 16 }
  0x16   :  { %p509_p8 = scmp.ne.s32.totalorder %s770_s0, %s508_s17  ;;  %p512_p9 = scmp.lt.u32.totalorder %s508_s17, %s770_s0 }
  0x18   :  { %p514_p10 = pnand %p512_p9, %p509_p8 }
  0x1a   :  { %517 = shalt.err (!%p514_p10)
}
  0x1b   :  { %s618_s22 = smov [#allocation2]   ;;  %s518_s26 = scalar_lea.hbm %s771_s1, 256 }
  0x1c   :  { %24 = dma.hbm_to_smem %s770_s0, 16, %s618_s22, [#allocation5]  }
  0x1d   :  { %p519_p11 = scmp.ne.s32.totalorder %s771_s1, %s518_s26  ;;  %p522_p12 = scmp.lt.u32.totalorder %s518_s26, %s771_s1 }
  0x1f   :  { %p524_p13 = pnand %p522_p12, %p519_p11 }
  0x21   :  { %527 = shalt.err (!%p524_p13)
}
  0x22   :  { %s528_s9 = scalar_lea.vmem %s31_s27, 256  ;;  %p533_p1 = scmp.lt.s32.totalorder %s31_s27, %s31_s27 }
  0x23   :  { %p529_p0 = scmp.ne.s32.totalorder %s31_s27, %s528_s9  ;;  %p534_p2 = scmp.lt.s32.totalorder %s528_s9, %s528_s9 }
  0x25   :  { %p535_p3 = por %p534_p2, %p533_p1 }
  0x27   :  { %p536_p4 = pnand %p535_p3, %p529_p0 }
  0x29   :  { %539 = shalt.err (!%p536_p4)
}
  0x2a   :  { %s619_s0 = smov 128   ;;  %s620_s10 = smov 8  }
  0x2b   :  { %36 = dma.hbm_to_vmem [thread:$0]  %s771_s1, 256, %s31_s27, [#allocation3], %s619_s0, %s619_s0, %s620_s10  }
  0x2c   :  { %s621_s13 = smov [#allocation9]   ;;  %s622_s15 = smov [#allocation10]  }
  0x2d   :  { %s52_s14 = sshll.u32 %s621_s13, 4  ;;  %s66_s16 = sshll.u32 %s622_s15, 4  ;;  %s53_s14 = int_to_ptr.vmem [resolvable:$true] %s52_s14  ;;  %s67_s16 = int_to_ptr.vmem [resolvable:$true] %s66_s16 }
  0x2e   :  { %s540_s19 = scalar_lea.hbm %s773_s3, 2048 }
  0x2f   :  { %p541_p5 = scmp.ne.s32.totalorder %s773_s3, %s540_s19  ;;  %p544_p6 = scmp.lt.u32.totalorder %s540_s19, %s773_s3 }
  0x31   :  { %p546_p7 = pnand %p544_p6, %p541_p5 }
  0x33   :  { %549 = shalt.err (!%p546_p7)
}
  0x34   :  { %s550_s1 = scalar_lea.vmem %s53_s14, 2048  ;;  %p555_p9 = scmp.lt.s32.totalorder %s53_s14, %s53_s14 }
  0x35   :  { %p551_p8 = scmp.ne.s32.totalorder %s53_s14, %s550_s1  ;;  %p556_p10 = scmp.lt.s32.totalorder %s550_s1, %s550_s1 }
  0x37   :  { %p557_p11 = por %p556_p10, %p555_p9 }
  0x39   :  { %p558_p12 = pnand %p557_p11, %p551_p8 }
  0x3b   :  { %561 = shalt.err (!%p558_p12)
}
  0x3c   :  { %58 = dma.hbm_to_vmem [thread:$0]  %s773_s3, 2048, %s53_s14, [#allocation8], %s619_s0, %s619_s0, %s620_s10  }
  0x3d   :  { %s562_s26 = scalar_lea.hbm %s775_s5, 2048 }
  0x3e   :  { %p563_p13 = scmp.ne.s32.totalorder %s775_s5, %s562_s26  ;;  %p566_p0 = scmp.lt.u32.totalorder %s562_s26, %s775_s5 }
  0x40   :  { %p568_p1 = pnand %p566_p0, %p563_p13 }
  0x42   :  { %571 = shalt.err (!%p568_p1)
}
  0x43   :  { %s572_s9 = scalar_lea.vmem %s67_s16, 2048  ;;  %p577_p3 = scmp.lt.s32.totalorder %s67_s16, %s67_s16 }
  0x44   :  { %p573_p2 = scmp.ne.s32.totalorder %s67_s16, %s572_s9  ;;  %p578_p4 = scmp.lt.s32.totalorder %s572_s9, %s572_s9 }
  0x46   :  { %p579_p5 = por %p578_p4, %p577_p3 }
  0x48   :  { %p580_p6 = pnand %p579_p5, %p573_p2 }
  0x4a   :  { %583 = shalt.err (!%p580_p6)
}
  0x4b   :  { %72 = dma.hbm_to_vmem [thread:$0]  %s775_s5, 2048, %s67_s16, [#allocation11], %s619_s0, %s619_s0, %s620_s10  }
  0x4c   :  { %606 = dma.done.wait [#allocation5], 16  }
  0x4d   :  { %607 = vsyncadd [#allocation5], 4294967280 }
  0x4e   :  { %608 = dma.done.wait [#allocation3], 256  }
  0x4f   :  { %609 = vsyncadd [#allocation3], 4294967040 }
  0x50   :  { %610 = dma.done.wait [#allocation8], 2176  }
  0x51   :  { %611 = vsyncadd [#allocation8], 4294965120 }
  0x52   :  { %612 = dma.done.wait [#allocation11], 2048  }
  0x53   :  { %613 = vsyncadd [#allocation11], 4294965248 }
  0x54   :  { %90 = sfence }
  0x55   :  { %v92_v0 = vld [vmem:[#allocation6] sm:$0xff]  ;;  %vm93_vm0 = vcmask 64512   ;;  %v101_v1 = vld [vmem:[#allocation6 + $0x8] sm:$0xff]  ;;  %v111_v2 = vld [vmem:[#allocation9] sm:$0xff]  ;;  %v623_v4 = vmov 0.0|0.0   ;;  %vm624_vm1 = vmmov 0  }
  0x56   :  { %v94_v3 = vsel %vm93_vm0, %v92_v0, 0.0  ;;  %425 = vmatprep.subr.bf16.mxu0 %v623_v4  ;;  %v112_v5 = vld [vmem:[#allocation9 + $0x8] sm:$0xff]  ;;  %v113_v6 = vld [vmem:[#allocation9 + $0x10] sm:$0xff]  ;;  %v114_v7 = vld [vmem:[#allocation9 + $0x18] sm:$0xff]  ;;  %449 = vmatprep.subr.bf16.mxu1 %v623_v4  ;;  %v102_v9 = vsel %vm93_vm0, %v101_v1, 0.0  ;;  %v625_v25 = vmov 0.0  }
  0x57   :  { %95 = vadd.xlane.f32.xlu0 %v94_v3  ;;  %v426_v8 = vpack.c.bf16 %v112_v5, %v111_v2  ;;  %v429_v10 = vpack.c.bf16 %v114_v7, %v113_v6  ;;  %v115_v11 = vld [vmem:[#allocation9 + $0x20] sm:$0xff]  ;;  %v116_v12 = vld [vmem:[#allocation9 + $0x28] sm:$0xff]  ;;  %v117_v14 = vld [vmem:[#allocation9 + $0x30] sm:$0xff]  ;;  %387 = vmatprep.mubr.msk.f32.mxu0 %vm624_vm1, %v625_v25  ;;  %s91_s5 = sld [smem:[#allocation2]]  ;;  %s318_s0 = sld [smem:[#allocation2 + $0x1]] }
  0x58   :  { %v432_v13 = vpack.c.bf16 %v116_v12, %v115_v11  ;;  %v118_v15 = vld [vmem:[#allocation9 + $0x38] sm:$0xff]  ;;  %v119_v17 = vld [vmem:[#allocation9 + $0x40] sm:$0xff]  ;;  %v120_v18 = vld [vmem:[#allocation9 + $0x48] sm:$0xff]  ;;  %422 = vmatprep.mubr.msk.f32.mxu1 %vm624_vm1, %v625_v25  ;;  %s626_s15 = smov [#allocation12]  }
  0x59   :  { %427 = vmatpush3.bf16.msra.mxu0 %v426_v8  ;;  %v435_v16 = vpack.c.bf16 %v118_v15, %v117_v14  ;;  %v438_v19 = vpack.c.bf16 %v120_v18, %v119_v17  ;;  %v121_v20 = vld [vmem:[#allocation9 + $0x50] sm:$0xff]  ;;  %v122_v21 = vld [vmem:[#allocation9 + $0x58] sm:$0xff]  ;;  %v123_v23 = vld [vmem:[#allocation9 + $0x60] sm:$0xff]  ;;  %s306_s16 = sshll.u32 %s626_s15, 4  ;;  %s307_s16 = int_to_ptr.vmem [resolvable:$true] %s306_s16 }
  0x5a   :  { %428 = vmatprep.subr.bf16.mxu0 %v623_v4  ;;  %v441_v22 = vpack.c.bf16 %v122_v21, %v121_v20  ;;  %v124_v24 = vld [vmem:[#allocation9 + $0x68] sm:$0xff]  ;;  %v125_v27 = vld [vmem:[#allocation9 + $0x70] sm:$0xff]  ;;  %v126_v28 = vld [vmem:[#allocation9 + $0x78] sm:$0xff]  ;;  %s584_s17 = scalar_lea.vmem %s307_s16, 128  ;;  %p589_p8 = scmp.lt.s32.totalorder %s307_s16, %s307_s16 }
  0x5b   :  { %103 = vadd.xlane.f32.xlu0 %v102_v9  ;;  %v444_v26 = vpack.c.bf16 %v124_v24, %v123_v23  ;;  %v447_v29 = vpack.c.bf16 %v126_v28, %v125_v27  ;;  %v206_v30 = vld [vmem:[#allocation10] sm:$0xff]  ;;  %v207_v31 = vld [vmem:[#allocation10 + $0x8] sm:$0xff]  ;;  %v208_v32 = vld [vmem:[#allocation10 + $0x10] sm:$0xff]  ;;  %p585_p7 = scmp.ne.s32.totalorder %s307_s16, %s584_s17  ;;  %p590_p9 = scmp.lt.s32.totalorder %s584_s17, %s584_s17 }
  0x5c   :  { %v450_v33 = vpack.c.bf16 %v207_v31, %v206_v30  ;;  %v209_v34 = vld [vmem:[#allocation10 + $0x18] sm:$0xff]  ;;  %v210_v36 = vld [vmem:[#allocation10 + $0x20] sm:$0xff]  ;;  %v211_v37 = vld [vmem:[#allocation10 + $0x28] sm:$0xff] }
  0x5d   :  { %430 = vmatpush3.bf16.msra.mxu0 %v429_v10  ;;  %v453_v35 = vpack.c.bf16 %v209_v34, %v208_v32  ;;  %v456_v38 = vpack.c.bf16 %v211_v37, %v210_v36  ;;  %v212_v39 = vld [vmem:[#allocation10 + $0x30] sm:$0xff]  ;;  %v213_v40 = vld [vmem:[#allocation10 + $0x38] sm:$0xff]  ;;  %v214_v42 = vld [vmem:[#allocation10 + $0x40] sm:$0xff]  ;;  %v97_v49 = vstv %s91_s5  ;;  %v105_v50 = vstv %s318_s0  ;;  %p591_p10 = por %p590_p9, %p589_p8 }
  0x5e   :  { %431 = vmatprep.subr.bf16.mxu0 %v623_v4  ;;  %451 = vmatpush3.bf16.msra.mxu1 %v450_v33  ;;  %v459_v41 = vpack.c.bf16 %v213_v40, %v212_v39  ;;  %v215_v43 = vld [vmem:[#allocation10 + $0x48] sm:$0xff]  ;;  %v216_v45 = vld [vmem:[#allocation10 + $0x50] sm:$0xff]  ;;  %v217_v46 = vld [vmem:[#allocation10 + $0x58] sm:$0xff] }
  0x5f   :  { %452 = vmatprep.subr.bf16.mxu1 %v623_v4  ;;  %v462_v44 = vpack.c.bf16 %v215_v43, %v214_v42  ;;  %v465_v47 = vpack.c.bf16 %v217_v46, %v216_v45  ;;  %v109_v55 = vld [vmem:[#allocation7] sm:$0xff]  ;;  %v218_v58 = vld [vmem:[#allocation10 + $0x60] sm:$0xff]  ;;  %v219_v59 = vld [vmem:[#allocation10 + $0x68] sm:$0xff]  ;;  %p592_p11 = pnand %p591_p10, %p585_p7 }
  0x60   :  { %v468_v60 = vpack.c.bf16 %v219_v59, %v218_v58  ;;  %v220_v61 = vld [vmem:[#allocation10 + $0x70] sm:$0xff]  ;;  %v221_v62 = vld [vmem:[#allocation10 + $0x78] sm:$0xff]  ;;  %v319_v0 = vld [vmem:[%s774_s4] ss:$0 sm:$0xff] }
  0x61   :  { %433 = vmatpush3.bf16.msra.mxu0 %v432_v13  ;;  %v471_v63 = vpack.c.bf16 %v221_v62, %v220_v61  ;;  %v320_v7 = vld [vmem:[%s776_s6] ss:$0 sm:$0xff] }
  0x62   :  { %434 = vmatprep.subr.bf16.mxu0 %v623_v4  ;;  %454 = vmatpush3.bf16.msra.mxu1 %v453_v35 }
  0x63   :  { %455 = vmatprep.subr.bf16.mxu1 %v623_v4 }
  0x65   :  { %436 = vmatpush3.bf16.msra.mxu0 %v435_v16 }
  0x66   :  { %437 = vmatprep.subr.bf16.mxu0 %v623_v4  ;;  %457 = vmatpush3.bf16.msra.mxu1 %v456_v38 }
  0x67   :  { %458 = vmatprep.subr.bf16.mxu1 %v623_v4 }
  0x69   :  { %439 = vmatpush3.bf16.msra.mxu0 %v438_v19 }
  0x6a   :  { %440 = vmatprep.subr.bf16.mxu0 %v623_v4  ;;  %460 = vmatpush3.bf16.msra.mxu1 %v459_v41 }
  0x6b   :  { %461 = vmatprep.subr.bf16.mxu1 %v623_v4 }
  0x6d   :  { %442 = vmatpush3.bf16.msra.mxu0 %v441_v22 }
  0x6e   :  { %443 = vmatprep.subr.bf16.mxu0 %v623_v4  ;;  %463 = vmatpush3.bf16.msra.mxu1 %v462_v44 }
  0x6f   :  { %464 = vmatprep.subr.bf16.mxu1 %v623_v4 }
  0x71   :  { %445 = vmatpush3.bf16.msra.mxu0 %v444_v26 }
  0x72   :  { %446 = vmatprep.subr.bf16.mxu0 %v623_v4  ;;  %466 = vmatpush3.bf16.msra.mxu1 %v465_v47 }
  0x73   :  { %467 = vmatprep.subr.bf16.mxu1 %v623_v4 }
  0x75   :  { %448 = vmatpush3.bf16.msra.mxu0 %v447_v29 }
  0x76   :  { %469 = vmatpush3.bf16.msra.mxu1 %v468_v60 }
  0x77   :  { %470 = vmatprep.subr.bf16.mxu1 %v623_v4 }
  0x7a   :  { %472 = vmatpush3.bf16.msra.mxu1 %v471_v63 }
  0xe4   :  { %v96_v48 = vpop.xlane.xlu0 %95 }
  0xe5   :  { %v98_v52 = vmul.f32 %v97_v49, %v96_v48 }
  0xe8   :  { %v104_v51 = vpop.xlane.xlu0 %103 }
  0xe9   :  { %v106_v53 = vmul.f32 %v105_v50, %v104_v51 }
  0xeb   :  { %v107_v54 = vadd.f32 %v106_v53, %v98_v52 }
  0xed   :  { %484 = vrsqrt.f32 %v107_v54 }
  0xf7   :  { %v485_v56 = vpop.eup %484 }
  0xf8   :  { %v110_v57 = vmul.f32 %v485_v56, %v109_v55 }
  0xfa   :  { %388 = vmatmul.mubr.f32.vlgmr.msra.gmra.mrb[0].mxu0 %v110_v57 }
 0x1cd   :  { %v200_v1 = vpop.f32.mrb[0].mxu0 }
 0x1ce   :  { %v201_v2 = vadd.f32 %v319_v0, %v200_v1  ;;  %v389_v3 = vpop.f32.mrb[1].mxu0 }
 0x1d0   :  { %v204_v5 = vmax.f32 %v201_v2, 0.0 }
 0x1d2   :  { %v205_v6 = vmul.f32 %v485_v56, %v204_v5 }
 0x1d4   :  { %423 = vmatmul.mubr.f32.vlgmr.msra.gmra.mrb[0].mxu1 %v205_v6 }
 0x2a7   :  { %v295_v4 = vpop.f32.mrb[0].mxu1 }
 0x2a8   :  { %v296_v8 = vadd.f32 %v320_v7, %v295_v4  ;;  %v424_v9 = vpop.f32.mrb[1].mxu1 }
 0x2aa   :  { %299 = vst [vmem:[#allocation12] sm:$0xff] %v296_v8 }
 0x2ab   :  { %595 = shalt.err (!%p592_p11)
}
 0x2ac   :  { %s596_s19 = scalar_lea.hbm %s777_s7, 128 }
 0x2ad   :  { %p597_p12 = scmp.ne.s32.totalorder %s777_s7, %s596_s19  ;;  %p600_p13 = scmp.lt.u32.totalorder %s596_s19, %s777_s7 }
 0x2af   :  { %p602_p0 = pnand %p600_p13, %p597_p12 }
 0x2b1   :  { %605 = shalt.err (!%p602_p0)
}
 0x2b2   :  { %309 = dma.vmem_to_hbm [thread:$0]  %s307_s16, 128, %s777_s7, [#allocation4]  }
 0x2b3   :  { %614 = dma.done.wait [#allocation4], 128  }
 0x2b4   :  { %615 = vsyncadd [#allocation4], 4294967168 }
 0x2b5   :  { %313 = vsyncpa [#allocation3], 1 }
 0x2b6   :  { %314 = vsyncpa [#allocation8], 1 }
 0x2b7   :  { %315 = vsyncpa [#allocation11], 1 }
 0x2b8   :  { %316 = vsyncpa [#allocation4], 1 }
 0x2b9   :  { %317 = vsyncpa [#allocation5], 1 }

</bundles_post_ra>
